<compile_context>
chip_gen: v7x
topology: tpu7x:2x2x1
jax: 0.10.0
libtpu: 0.0.40
codegen_flags: <defaults>
</compile_context>

<pallas_src>
import functools

import jax
import jax.numpy as jnp
from jax.experimental import pallas as pl
from jax.experimental.pallas import tpu as pltpu


# ----------------------------------------------------------------------------- helpers
def _round_up(x, m):
    return ((x + m - 1) // m) * m


def _apply_act(z, act_func):
    a = act_func.lower()
    if a == "relu":
        return jnp.maximum(z, 0.0)
    if a == "sigmoid":
        return jax.nn.sigmoid(z)
    return z  # identity fall-through, matches MLP.activation


def _pad2d(a, rows, cols):
    r, c = a.shape
    if r == rows and c == cols:
        return a
    return jnp.pad(a, ((0, rows - r), (0, cols - c)))


def _resolve_compute_dtype(compute_dtype, x_dtype):
    """'auto' -> bf16 (fast MXU path on v5e/v6e/v7x); None -> keep input dtype."""
    if compute_dtype is None:
        return jnp.dtype(x_dtype)
    if isinstance(compute_dtype, str):
        return jnp.dtype(jnp.bfloat16)
    return jnp.dtype(compute_dtype)


@functools.lru_cache(maxsize=None)
def _usable_vmem_bytes():
    """Generation-aware VMEM budget: ~75% of per-core VMEM capacity.
    v5e/v6e (128 MiB) -> ~96 MiB; v7x (64 MiB/TC) -> ~48 MiB; unknown -> 48 MiB."""
    cap = None
    try:
        info = pltpu.get_tpu_info()
        for attr in ("vmem_capacity_bytes", "vmem_bytes", "vmem_size_bytes"):
            v = getattr(info, attr, None)
            if v:
                cap = int(v)
                break
    except Exception:
        cap = None
    if cap is None or cap <= 0:
        cap = 64 << 20  # conservative fallback = v7x per-TensorCore VMEM
    return max(int(0.75 * cap), 32 << 20)


# ----------------------------------------------------------------------------- fused whole-MLP kernel
def _fused_mlp_kernel(*refs, n_layers, act_func):
    # refs = (x_ref, w0, b0, w1, b1, ..., w_{L-1}, b_{L-1}, o_ref)
    x_ref = refs[0]
    o_ref = refs[-1]
    h = x_ref[...]
    for l in range(n_layers):
        w = refs[1 + 2 * l][...]            # (d_in_pad, d_out_pad), pre-transposed
        b = refs[2 + 2 * l][...]            # (1, d_out_pad), f32
        z = jnp.dot(h, w, preferred_element_type=jnp.float32) + b   # f32 accumulate
        if l < n_layers - 1:
            z = _apply_act(z, act_func)
            h = z.astype(w.dtype)           # keep compute dtype for the next MXU op
        else:
            h = z
    o_ref[...] = h.astype(o_ref.dtype)


def fused_mlp_pallas(x, layers, *, act_func="relu", bm=None, compute_dtype="auto"):
    """Run the whole MLP in a single pallas_call (weights resident in VMEM)."""
    n, d_in = x.shape
    out_dtype = x.dtype
    comp = _resolve_compute_dtype(compute_dtype, x.dtype)
    if comp != x.dtype:
        x = x.astype(comp)
    comp_item = jnp.dtype(comp).itemsize
    out_item = jnp.dtype(out_dtype).itemsize
    sub = 16 if comp == jnp.bfloat16 else 8

    dims = [d_in] + [w.shape[0] for (w, _) in layers]          # torch: (d_out, d_in)
    for l, (w, _) in enumerate(layers):
        assert w.shape[1] == dims[l], "layer dims must chain"
    dims_pad = [_round_up(d, 128) for d in dims]
    max_pad = max(dims_pad)
    d_out, d_out_pad = dims[-1], dims_pad[-1]

    budget = _usable_vmem_bytes()
    weight_bytes = sum(dims_pad[l] * dims_pad[l + 1] * comp_item + dims_pad[l + 1] * 4
                       for l in range(len(layers)))

    def _est(bm_, wfac):
        io = 2 * bm_ * dims_pad[0] * comp_item + 2 * bm_ * d_out_pad * out_item
        inter = bm_ * max_pad * (4 + comp_item)      # f32 z + compute-dtype h
        return wfac * weight_bytes + io + inter

    # Batch tile: large (amortize per-step overhead, feed the 256-wide MXU), but
    # keep >=2 grid steps for v7x's two TensorCores when the batch is big enough,
    # and shrink if resident weights + tiles would overflow the VMEM budget.
    if bm is None:
        bm = 512
    bm = min(bm, _round_up(n, sub))
    if n >= 512 and _round_up(n, bm) // bm < 2:
        bm = _round_up((n + 1) // 2, sub)
    while bm > sub and _est(bm, 1) > budget:
        bm = max(_round_up(bm // 2, sub), sub)
    m_pad = _round_up(n, bm)

    operands = [_pad2d(x, m_pad, dims_pad[0])]
    wb_shapes = []
    for l, (w, b) in enumerate(layers):
        wt = w.T.astype(comp)                                  # one-time HBM-side transpose + cast
        w_p = _pad2d(wt, dims_pad[l], dims_pad[l + 1])
        b_p = _pad2d(b.reshape(1, -1).astype(jnp.float32), 1, dims_pad[l + 1])
        operands += [w_p, b_p]
        wb_shapes += [w_p.shape, b_p.shape]

    flops = 2 * m_pad * sum(dims_pad[l] * dims_pad[l + 1] for l in range(len(layers)))
    transcendentals = m_pad * sum(dims_pad[1:-1]) if act_func.lower() == "sigmoid" else 0
    bytes_accessed = int(sum(op.size * op.dtype.itemsize for op in operands)
                         + m_pad * d_out_pad * out_item)

    kernel = functools.partial(_fused_mlp_kernel, n_layers=len(layers), act_func=act_func)

    def _call(single_buffer_weights):
        in_specs = [pl.BlockSpec((bm, dims_pad[0]), lambda i: (i, 0))]
        for shp in wb_shapes:
            if single_buffer_weights:
                # Grid-invariant block (index_map always (0,0)): single-buffer it,
                # halving the resident VMEM held by weights/biases.
                in_specs.append(pl.BlockSpec(shp, lambda i: (0, 0),
                                             pipeline_mode=pl.Buffered(1)))
            else:
                in_specs.append(pl.BlockSpec(shp, lambda i: (0, 0)))
        wfac = 1 if single_buffer_weights else 2
        vmem_limit = int(min(max(2 * _est(bm, wfac), 16 << 20), budget))
        return pl.pallas_call(
            kernel,
            out_shape=jax.ShapeDtypeStruct((m_pad, d_out_pad), out_dtype),
            grid_spec=pltpu.PrefetchScalarGridSpec(
                num_scalar_prefetch=0,
                grid=(m_pad // bm,),
                in_specs=in_specs,
                out_specs=pl.BlockSpec((bm, d_out_pad), lambda i: (i, 0)),
            ),
            compiler_params=pltpu.CompilerParams(
                dimension_semantics=("parallel",),
                vmem_limit_bytes=vmem_limit,
            ),
            cost_estimate=pl.CostEstimate(flops=flops, transcendentals=transcendentals,
                                          bytes_accessed=bytes_accessed),
        )(*operands)

    try:
        out = _call(True)
    except Exception:
        out = _call(False)     # Buffered(1) unsupported -> default double buffering
    return out[:n, :d_out]


# ----------------------------------------------------------------------------- tiled single linear layer
def _linear_kernel_acc(x_ref, w_ref, b_ref, o_ref, acc_ref, *, apply_act, act_func):
    k = pl.program_id(2)

    @pl.when(k == 0)
    def _():
        acc_ref[...] = jnp.zeros_like(acc_ref)

    acc_ref[...] += jnp.dot(x_ref[...], w_ref[...], preferred_element_type=jnp.float32)

    @pl.when(k == pl.num_programs(2) - 1)
    def _():
        y = acc_ref[...] + b_ref[...]
        if apply_act:
            y = _apply_act(y, act_func)
        o_ref[...] = y.astype(o_ref.dtype)


def _linear_kernel_single_k(x_ref, w_ref, b_ref, o_ref, *, apply_act, act_func):
    # K fits one block: no accumulator read-modify-write, write the tile directly.
    y = jnp.dot(x_ref[...], w_ref[...], preferred_element_type=jnp.float32) + b_ref[...]
    if apply_act:
        y = _apply_act(y, act_func)
    o_ref[...] = y.astype(o_ref.dtype)


def linear_pallas(x, w, b, *, apply_act, act_func="relu",
                  bm=None, bn=None, bk=None, compute_dtype="auto"):
    """y = act(x @ w.T + b) with M/N(/K) tiling and f32 accumulation."""
    n, d_in = x.shape
    d_out, d_in_w = w.shape
    assert d_in == d_in_w
    out_dtype = x.dtype
    comp = _resolve_compute_dtype(compute_dtype, x.dtype)
    x = x.astype(comp)
    wt = w.T.astype(comp)                                      # (d_in, d_out): one-time transpose + cast
    comp_item = jnp.dtype(comp).itemsize
    out_item = jnp.dtype(out_dtype).itemsize
    sub = 16 if comp == jnp.bfloat16 else 8

    # Large tiles: cut W re-streaming (M/bm passes over W) and X re-streaming
    # (N/bn passes over X), amortize ~0.35us/grid-step overhead; all 128-multiples
    # (>=256 wide where dims allow, matching the v6e/v7x 256x256 MXU).
    if bm is None:
        bm = 512
    bm = min(bm, _round_up(n, sub))
    if bn is None:
        bn = min(512, _round_up(d_out, 128))
    if bk is None:
        bk = min(1024, _round_up(d_in, 128))

    # Keep >=2 steps on a parallel axis for v7x's two TensorCores when the batch
    # is big enough to be worth splitting.
    if (n >= 256 and _round_up(n, bm) // bm < 2
            and _round_up(d_out, bn) // bn < 2):
        bm = _round_up((n + 1) // 2, sub)

    m_pad = _round_up(n, bm)
    n_pad = _round_up(d_out, bn)
    k_pad = _round_up(d_in, bk)
    gm, gn, gk = m_pad // bm, n_pad // bn, k_pad // bk

    x_p = _pad2d(x, m_pad, k_pad)
    w_p = _pad2d(wt, k_pad, n_pad)
    b_p = _pad2d(b.reshape(1, d_out).astype(jnp.float32), 1, n_pad)

    flops = 2 * m_pad * k_pad * n_pad
    transcendentals = m_pad * n_pad if (apply_act and act_func.lower() == "sigmoid") else 0
    # Account for re-streaming: X is read once per N-tile, W once per M-tile.
    bytes_accessed = int(gn * m_pad * k_pad * comp_item
                         + gm * k_pad * n_pad * comp_item
                         + gm * n_pad * 4
                         + m_pad * n_pad * out_item)

    x_tile = bm * bk * comp_item
    w_tile = bk * bn * comp_item
    o_tile = bm * bn * out_item
    acc_tile = bm * bn * 4
    budget = _usable_vmem_bytes()
    need = 2 * (x_tile + w_tile + bn * 4 + o_tile) + (acc_tile if gk > 1 else 0)
    vmem_limit = int(min(max(2 * need, 16 << 20), budget))

    if gk == 1:
        kernel = functools.partial(_linear_kernel_single_k,
                                   apply_act=apply_act, act_func=act_func)
        grid = (gm, gn)
        in_specs = [
            pl.BlockSpec((bm, bk), lambda i, j: (i, 0)),       # activation tile
            pl.BlockSpec((bk, bn), lambda i, j: (0, j)),       # weight tile (pre-transposed)
            pl.BlockSpec((1, bn), lambda i, j: (0, j)),        # bias tile
        ]
        out_specs = pl.BlockSpec((bm, bn), lambda i, j: (i, j))
        scratch = []
        dims_sem = ("parallel", "parallel")
    else:
        kernel = functools.partial(_linear_kernel_acc,
                                   apply_act=apply_act, act_func=act_func)
        grid = (gm, gn, gk)
        in_specs = [
            pl.BlockSpec((bm, bk), lambda i, j, k: (i, k)),
            pl.BlockSpec((bk, bn), lambda i, j, k: (k, j)),
            pl.BlockSpec((1, bn), lambda i, j, k: (0, j)),
        ]
        out_specs = pl.BlockSpec((bm, bn), lambda i, j, k: (i, j))
        scratch = [pltpu.VMEM((bm, bn), jnp.float32)]
        dims_sem = ("parallel", "parallel", "arbitrary")

    out = pl.pallas_call(
        kernel,
        out_shape=jax.ShapeDtypeStruct((m_pad, n_pad), out_dtype),
        grid_spec=pltpu.PrefetchScalarGridSpec(
            num_scalar_prefetch=0,
            grid=grid,
            in_specs=in_specs,
            out_specs=out_specs,
            scratch_shapes=scratch,
        ),
        compiler_params=pltpu.CompilerParams(
            dimension_semantics=dims_sem,
            vmem_limit_bytes=vmem_limit,
        ),
        cost_estimate=pl.CostEstimate(flops=flops, transcendentals=transcendentals,
                                      bytes_accessed=bytes_accessed),
    )(x_p, w_p, b_p)
    return out[:n, :d_out]


# ----------------------------------------------------------------------------- params + forward
def init_linear_params(key, d_in, d_out, dtype=jnp.float32):
    """Mirror torch.nn.Linear default init (uniform +/- 1/sqrt(d_in))."""
    kw, kb = jax.random.split(key)
    bound = 1.0 / jnp.sqrt(jnp.asarray(d_in, dtype))
    w = jax.random.uniform(kw, (d_out, d_in), dtype, minval=-bound, maxval=bound)
    b = jax.random.uniform(kb, (d_out,), dtype, minval=-bound, maxval=bound)
    return w, b


def init_mlp_params(key, d_input, d_hidden, d_output):
    if isinstance(d_hidden, int):
        d_hidden = [d_hidden]
    keys = jax.random.split(key, len(d_hidden) + 1)
    params = {"input": init_linear_params(keys[0], d_input, d_hidden[0]), "hidden": []}
    for i in range(1, len(d_hidden)):
        params["hidden"].append(init_linear_params(keys[i], d_hidden[i - 1], d_hidden[i]))
    params["output"] = init_linear_params(keys[-1], d_input if False else d_hidden[-1], d_output)
    return params


def mlp_forward(x, params, act_func="relu", compute_dtype="auto"):
    """Equivalent of MLP.forward: act(W_in x + b) -> [act(W_h . + b)]* -> W_out . + b."""
    comp = _resolve_compute_dtype(compute_dtype, x.dtype)
    layers = [params["input"]] + list(params["hidden"]) + [params["output"]]
    dims = [x.shape[1]] + [w.shape[0] for (w, _) in layers]
    dims_pad = [_round_up(d, 128) for d in dims]
    comp_item = jnp.dtype(comp).itemsize
    out_item = jnp.dtype(x.dtype).itemsize
    sub = 16 if comp == jnp.bfloat16 else 8
    weight_bytes = sum(dims_pad[i] * dims_pad[i + 1] * comp_item + dims_pad[i + 1] * 4
                       for i in range(len(layers)))
    bm_guess = min(512, _round_up(x.shape[0], sub))
    io_est = (2 * bm_guess * dims_pad[0] * comp_item
              + 2 * bm_guess * dims_pad[-1] * out_item
              + bm_guess * max(dims_pad) * (4 + comp_item))

    # Fuse the whole network when single-buffered resident weights + I/O tiles fit
    # the generation-aware VMEM budget; else fall back to tiled per-layer kernels.
    if weight_bytes + io_est <= _usable_vmem_bytes():
        try:
            return fused_mlp_pallas(x, layers, act_func=act_func, compute_dtype=comp)
        except Exception:
            pass  # fall through to the tiled per-layer path

    h = x
    for (w, b) in layers[:-1]:
        h = linear_pallas(h, w, b, apply_act=True, act_func=act_func, compute_dtype=comp)
    w, b = layers[-1]
    return linear_pallas(h, w, b, apply_act=False, act_func=act_func, compute_dtype=comp)


def mlp_forward_ref(x, params, act_func="relu"):
    """Pure-JAX reference (highest precision) for verification."""
    hp = jax.lax.Precision.HIGHEST

    def act(z):
        return _apply_act(z, act_func)

    w_in, b_in = params["input"]
    h = act(jnp.dot(x, w_in.T, precision=hp) + b_in)
    for (w, b) in params["hidden"]:
        h = act(jnp.dot(h, w.T, precision=hp) + b)
    w_out, b_out = params["output"]
    return jnp.dot(h, w_out.T, precision=hp) + b_out


# ----------------------------------------------------------------------------- demo / self-check
if __name__ == "__main__":
    key = jax.random.PRNGKey(0)
    k_params, k_x, k_x2, k_w2, k_b2 = jax.random.split(key, 5)

    # 1) Small MLP (fused single-kernel path).
    d_input, d_hidden, d_output = 16, [32, 32], 4
    batch = 16
    params = init_mlp_params(k_params, d_input, d_hidden, d_output)
    x = jax.random.normal(k_x, (batch, d_input), jnp.float32)
    y_ref = mlp_forward_ref(x, params, act_func="relu")

    # Exact path (f32 MXU compute) — bit-tight vs. reference.
    y_f32 = jax.block_until_ready(mlp_forward(x, params, act_func="relu",
                                              compute_dtype=jnp.float32))
    assert y_f32.shape == (batch, d_output)
    assert jnp.allclose(y_f32, y_ref, atol=1e-5, rtol=1e-5)

    # Default fast path (bf16 MXU compute, f32 accumulation) — looser tolerance.
    y_bf16 = jax.block_until_ready(mlp_forward(x, params, act_func="relu"))
    assert jnp.allclose(y_bf16, y_ref, atol=8e-2, rtol=8e-2)

    # Sigmoid activation, exact path.
    y_sig = jax.block_until_ready(mlp_forward(x, params, act_func="sigmoid",
                                              compute_dtype=jnp.float32))
    y_sig_ref = mlp_forward_ref(x, params, act_func="sigmoid")
    assert jnp.allclose(y_sig, y_sig_ref, atol=1e-5, rtol=1e-5)

    # 2) Tiled per-layer path (ragged batch, non-128 feature dims).
    n2, d_in2, d_out2 = 300, 192, 96
    x2 = jax.random.normal(k_x2, (n2, d_in2), jnp.float32)
    bound2 = 1.0 / jnp.sqrt(jnp.asarray(d_in2, jnp.float32))
    w2 = jax.random.uniform(k_w2, (d_out2, d_in2), jnp.float32, minval=-bound2, maxval=bound2)
    b2 = jax.random.uniform(k_b2, (d_out2,), jnp.float32, minval=-bound2, maxval=bound2)
    y2_ref = jnp.maximum(jnp.dot(x2, w2.T, precision=jax.lax.Precision.HIGHEST) + b2, 0.0)

    y2_f32 = jax.block_until_ready(linear_pallas(x2, w2, b2, apply_act=True, act_func="relu",
                                                 compute_dtype=jnp.float32))
    assert y2_f32.shape == (n2, d_out2)
    assert jnp.allclose(y2_f32, y2_ref, atol=5e-4, rtol=5e-4)

    y2_bf16 = jax.block_until_ready(linear_pallas(x2, w2, b2, apply_act=True, act_func="relu"))
    assert jnp.allclose(y2_bf16, y2_ref, atol=8e-2, rtol=8e-2)

    print("KERNEL_OK")
</pallas_src>

<mosaic_0001>
module attributes {stable_mosaic.version = 11 : i64} {
  func.func @_fused_mlp_kernel(%arg0: i32, %arg1: memref<16x128xf32, #tpu.memory_space<vmem>>, %arg2: memref<128x128xf32, #tpu.memory_space<vmem>>, %arg3: memref<1x128xf32, #tpu.memory_space<vmem>>, %arg4: memref<128x128xf32, #tpu.memory_space<vmem>>, %arg5: memref<1x128xf32, #tpu.memory_space<vmem>>, %arg6: memref<128x128xf32, #tpu.memory_space<vmem>>, %arg7: memref<1x128xf32, #tpu.memory_space<vmem>>, %arg8: memref<16x128xf32, #tpu.memory_space<vmem>>) attributes {dimension_semantics = [#tpu.dimension_semantics<parallel>], iteration_bounds = array<i64: 1>, scalar_prefetch = 0 : i64, scratch_operands = 0 : i64, tpu.core_type = #tpu.core_type<tc>, window_params = [{transform_indices = @transform_0, window_bounds = array<i64: 16, 128>}, {pipeline_mode = #tpu.pipeline_mode<synchronous>, transform_indices = @transform_1, window_bounds = array<i64: 128, 128>}, {pipeline_mode = #tpu.pipeline_mode<synchronous>, transform_indices = @transform_2, window_bounds = array<i64: 1, 128>}, {pipeline_mode = #tpu.pipeline_mode<synchronous>, transform_indices = @transform_3, window_bounds = array<i64: 128, 128>}, {pipeline_mode = #tpu.pipeline_mode<synchronous>, transform_indices = @transform_4, window_bounds = array<i64: 1, 128>}, {pipeline_mode = #tpu.pipeline_mode<synchronous>, transform_indices = @transform_5, window_bounds = array<i64: 128, 128>}, {pipeline_mode = #tpu.pipeline_mode<synchronous>, transform_indices = @transform_6, window_bounds = array<i64: 1, 128>}, {transform_indices = @transform_7, window_bounds = array<i64: 16, 128>}]} {
    %c0 = arith.constant 0 : index
    %c0_0 = arith.constant 0 : index
    %0 = vector.load %arg1[%c0, %c0_0] : memref<16x128xf32, #tpu.memory_space<vmem>>, vector<16x128xf32>
    %c0_1 = arith.constant 0 : index
    %c0_2 = arith.constant 0 : index
    %1 = vector.load %arg2[%c0_1, %c0_2] : memref<128x128xf32, #tpu.memory_space<vmem>>, vector<128x128xf32>
    %c0_3 = arith.constant 0 : index
    %c0_4 = arith.constant 0 : index
    %2 = vector.load %arg3[%c0_3, %c0_4] : memref<1x128xf32, #tpu.memory_space<vmem>>, vector<1x128xf32>
    %cst = arith.constant dense<0.000000e+00> : vector<16x128xf32>
    %3 = tpu.matmul %0, %1, %cst {dimension_numbers = #tpu.dot_dimension_numbers<[1], [0], [0], [1], [0, 0, 1, 1], [], []>} : vector<16x128xf32>, vector<128x128xf32>, vector<16x128xf32> -> vector<16x128xf32>
    %4 = vector.broadcast %2 : vector<1x128xf32> to vector<16x128xf32>
    %5 = arith.addf %3, %4 : vector<16x128xf32>
    %cst_5 = arith.constant 0.000000e+00 : f32
    %6 = vector.broadcast %cst_5 : f32 to vector<16x128xf32>
    %7 = arith.maximumf %5, %6 : vector<16x128xf32>
    %c0_6 = arith.constant 0 : index
    %c0_7 = arith.constant 0 : index
    %8 = vector.load %arg4[%c0_6, %c0_7] : memref<128x128xf32, #tpu.memory_space<vmem>>, vector<128x128xf32>
    %c0_8 = arith.constant 0 : index
    %c0_9 = arith.constant 0 : index
    %9 = vector.load %arg5[%c0_8, %c0_9] : memref<1x128xf32, #tpu.memory_space<vmem>>, vector<1x128xf32>
    %cst_10 = arith.constant dense<0.000000e+00> : vector<16x128xf32>
    %10 = tpu.matmul %7, %8, %cst_10 {dimension_numbers = #tpu.dot_dimension_numbers<[1], [0], [0], [1], [0, 0, 1, 1], [], []>} : vector<16x128xf32>, vector<128x128xf32>, vector<16x128xf32> -> vector<16x128xf32>
    %11 = vector.broadcast %9 : vector<1x128xf32> to vector<16x128xf32>
    %12 = arith.addf %10, %11 : vector<16x128xf32>
    %cst_11 = arith.constant 0.000000e+00 : f32
    %13 = vector.broadcast %cst_11 : f32 to vector<16x128xf32>
    %14 = arith.maximumf %12, %13 : vector<16x128xf32>
    %c0_12 = arith.constant 0 : index
    %c0_13 = arith.constant 0 : index
    %15 = vector.load %arg6[%c0_12, %c0_13] : memref<128x128xf32, #tpu.memory_space<vmem>>, vector<128x128xf32>
    %c0_14 = arith.constant 0 : index
    %c0_15 = arith.constant 0 : index
    %16 = vector.load %arg7[%c0_14, %c0_15] : memref<1x128xf32, #tpu.memory_space<vmem>>, vector<1x128xf32>
    %cst_16 = arith.constant dense<0.000000e+00> : vector<16x128xf32>
    %17 = tpu.matmul %14, %15, %cst_16 {dimension_numbers = #tpu.dot_dimension_numbers<[1], [0], [0], [1], [0, 0, 1, 1], [], []>} : vector<16x128xf32>, vector<128x128xf32>, vector<16x128xf32> -> vector<16x128xf32>
    %18 = vector.broadcast %16 : vector<1x128xf32> to vector<16x128xf32>
    %19 = arith.addf %17, %18 : vector<16x128xf32>
    %c0_17 = arith.constant 0 : index
    %c0_18 = arith.constant 0 : index
    %20 = vector.load %arg8[%c0_17, %c0_18] : memref<16x128xf32, #tpu.memory_space<vmem>>, vector<16x128xf32>
    tpu.vector_store %arg8[%c0_17, %c0_18], %19 {strides = array<i32>} : memref<16x128xf32, #tpu.memory_space<vmem>>, vector<16x128xf32>,
    return
  }
  func.func @transform_0(%arg0: i32) -> (i32, i32) {
    %c0_i32 = arith.constant 0 : i32
    %c0_i32_0 = arith.constant 0 : i32
    return %arg0, %c0_i32 : i32, i32
  }
  func.func @transform_1(%arg0: i32) -> (i32, i32) {
    %c0_i32 = arith.constant 0 : i32
    %c0_i32_0 = arith.constant 0 : i32
    %c0_i32_1 = arith.constant 0 : i32
    return %c0_i32, %c0_i32_0 : i32, i32
  }
  func.func @transform_2(%arg0: i32) -> (i32, i32) {
    %c0_i32 = arith.constant 0 : i32
    %c0_i32_0 = arith.constant 0 : i32
    %c0_i32_1 = arith.constant 0 : i32
    return %c0_i32, %c0_i32_0 : i32, i32
  }
  func.func @transform_3(%arg0: i32) -> (i32, i32) {
    %c0_i32 = arith.constant 0 : i32
    %c0_i32_0 = arith.constant 0 : i32
    %c0_i32_1 = arith.constant 0 : i32
    return %c0_i32, %c0_i32_0 : i32, i32
  }
  func.func @transform_4(%arg0: i32) -> (i32, i32) {
    %c0_i32 = arith.constant 0 : i32
    %c0_i32_0 = arith.constant 0 : i32
    %c0_i32_1 = arith.constant 0 : i32
    return %c0_i32, %c0_i32_0 : i32, i32
  }
  func.func @transform_5(%arg0: i32) -> (i32, i32) {
    %c0_i32 = arith.constant 0 : i32
    %c0_i32_0 = arith.constant 0 : i32
    %c0_i32_1 = arith.constant 0 : i32
    return %c0_i32, %c0_i32_0 : i32, i32
  }
  func.func @transform_6(%arg0: i32) -> (i32, i32) {
    %c0_i32 = arith.constant 0 : i32
    %c0_i32_0 = arith.constant 0 : i32
    %c0_i32_1 = arith.constant 0 : i32
    return %c0_i32, %c0_i32_0 : i32, i32
  }
  func.func @transform_7(%arg0: i32) -> (i32, i32) {
    %c0_i32 = arith.constant 0 : i32
    %c0_i32_0 = arith.constant 0 : i32
    return %arg0, %c0_i32 : i32, i32
  }
}

module attributes {stable_mosaic.version = 11 : i64} {
  func.func @_fused_mlp_kernel(%arg0: i32, %arg1: memref<16x128xf32, #tpu.memory_space<vmem>>, %arg2: memref<128x128xf32, #tpu.memory_space<vmem>>, %arg3: memref<1x128xf32, #tpu.memory_space<vmem>>, %arg4: memref<128x128xf32, #tpu.memory_space<vmem>>, %arg5: memref<1x128xf32, #tpu.memory_space<vmem>>, %arg6: memref<128x128xf32, #tpu.memory_space<vmem>>, %arg7: memref<1x128xf32, #tpu.memory_space<vmem>>, %arg8: memref<16x128xf32, #tpu.memory_space<vmem>>) attributes {dimension_semantics = [#tpu.dimension_semantics<parallel>], iteration_bounds = array<i64: 1>, scalar_prefetch = 0 : i64, scratch_operands = 0 : i64, tpu.core_type = #tpu.core_type<tc>, window_params = [{transform_indices = @transform_0, window_bounds = array<i64: 16, 128>}, {pipeline_mode = #tpu.pipeline_mode<synchronous>, transform_indices = @transform_1, window_bounds = array<i64: 128, 128>}, {pipeline_mode = #tpu.pipeline_mode<synchronous>, transform_indices = @transform_2, window_bounds = array<i64: 1, 128>}, {pipeline_mode = #tpu.pipeline_mode<synchronous>, transform_indices = @transform_3, window_bounds = array<i64: 128, 128>}, {pipeline_mode = #tpu.pipeline_mode<synchronous>, transform_indices = @transform_4, window_bounds = array<i64: 1, 128>}, {pipeline_mode = #tpu.pipeline_mode<synchronous>, transform_indices = @transform_5, window_bounds = array<i64: 128, 128>}, {pipeline_mode = #tpu.pipeline_mode<synchronous>, transform_indices = @transform_6, window_bounds = array<i64: 1, 128>}, {transform_indices = @transform_7, window_bounds = array<i64: 16, 128>}]} {
    %c0 = arith.constant 0 : index
    %c0_0 = arith.constant 0 : index
    %0 = vector.load %arg1[%c0, %c0_0] : memref<16x128xf32, #tpu.memory_space<vmem>>, vector<16x128xf32>
    %c0_1 = arith.constant 0 : index
    %c0_2 = arith.constant 0 : index
    %1 = vector.load %arg2[%c0_1, %c0_2] : memref<128x128xf32, #tpu.memory_space<vmem>>, vector<128x128xf32>
    %c0_3 = arith.constant 0 : index
    %c0_4 = arith.constant 0 : index
    %2 = vector.load %arg3[%c0_3, %c0_4] : memref<1x128xf32, #tpu.memory_space<vmem>>, vector<1x128xf32>
    %cst = arith.constant dense<0.000000e+00> : vector<16x128xf32>
    %3 = tpu.matmul %0, %1, %cst {dimension_numbers = #tpu.dot_dimension_numbers<[1], [0], [0], [1], [0, 0, 1, 1], [], []>} : vector<16x128xf32>, vector<128x128xf32>, vector<16x128xf32> -> vector<16x128xf32>
    %4 = vector.broadcast %2 : vector<1x128xf32> to vector<16x128xf32>
    %5 = arith.addf %3, %4 : vector<16x128xf32>
    %cst_5 = arith.constant 0.000000e+00 : f32
    %6 = vector.broadcast %cst_5 : f32 to vector<16x128xf32>
    %7 = arith.maximumf %5, %6 : vector<16x128xf32>
    %c0_6 = arith.constant 0 : index
    %c0_7 = arith.constant 0 : index
    %8 = vector.load %arg4[%c0_6, %c0_7] : memref<128x128xf32, #tpu.memory_space<vmem>>, vector<128x128xf32>
    %c0_8 = arith.constant 0 : index
    %c0_9 = arith.constant 0 : index
    %9 = vector.load %arg5[%c0_8, %c0_9] : memref<1x128xf32, #tpu.memory_space<vmem>>, vector<1x128xf32>
    %cst_10 = arith.constant dense<0.000000e+00> : vector<16x128xf32>
    %10 = tpu.matmul %7, %8, %cst_10 {dimension_numbers = #tpu.dot_dimension_numbers<[1], [0], [0], [1], [0, 0, 1, 1], [], []>} : vector<16x128xf32>, vector<128x128xf32>, vector<16x128xf32> -> vector<16x128xf32>
    %11 = vector.broadcast %9 : vector<1x128xf32> to vector<16x128xf32>
    %12 = arith.addf %10, %11 : vector<16x128xf32>
    %cst_11 = arith.constant 0.000000e+00 : f32
    %13 = vector.broadcast %cst_11 : f32 to vector<16x128xf32>
    %14 = arith.maximumf %12, %13 : vector<16x128xf32>
    %c0_12 = arith.constant 0 : index
    %c0_13 = arith.constant 0 : index
    %15 = vector.load %arg6[%c0_12, %c0_13] : memref<128x128xf32, #tpu.memory_space<vmem>>, vector<128x128xf32>
    %c0_14 = arith.constant 0 : index
    %c0_15 = arith.constant 0 : index
    %16 = vector.load %arg7[%c0_14, %c0_15] : memref<1x128xf32, #tpu.memory_space<vmem>>, vector<1x128xf32>
    %cst_16 = arith.constant dense<0.000000e+00> : vector<16x128xf32>
    %17 = tpu.matmul %14, %15, %cst_16 {dimension_numbers = #tpu.dot_dimension_numbers<[1], [0], [0], [1], [0, 0, 1, 1], [], []>} : vector<16x128xf32>, vector<128x128xf32>, vector<16x128xf32> -> vector<16x128xf32>
    %18 = vector.broadcast %16 : vector<1x128xf32> to vector<16x128xf32>
    %19 = arith.addf %17, %18 : vector<16x128xf32>
    %c0_17 = arith.constant 0 : index
    %c0_18 = arith.constant 0 : index
    %20 = vector.load %arg8[%c0_17, %c0_18] : memref<16x128xf32, #tpu.memory_space<vmem>>, vector<16x128xf32>
    tpu.vector_store %arg8[%c0_17, %c0_18], %19 {strides = array<i32>} : memref<16x128xf32, #tpu.memory_space<vmem>>, vector<16x128xf32>,
    return
  }
  func.func @transform_0(%arg0: i32) -> (i32, i32) {
    %c0_i32 = arith.constant 0 : i32
    %c0_i32_0 = arith.constant 0 : i32
    return %arg0, %c0_i32 : i32, i32
  }
  func.func @transform_1(%arg0: i32) -> (i32, i32) {
    %c0_i32 = arith.constant 0 : i32
    %c0_i32_0 = arith.constant 0 : i32
    %c0_i32_1 = arith.constant 0 : i32
    return %c0_i32, %c0_i32_0 : i32, i32
  }
  func.func @transform_2(%arg0: i32) -> (i32, i32) {
    %c0_i32 = arith.constant 0 : i32
    %c0_i32_0 = arith.constant 0 : i32
    %c0_i32_1 = arith.constant 0 : i32
    return %c0_i32, %c0_i32_0 : i32, i32
  }
  func.func @transform_3(%arg0: i32) -> (i32, i32) {
    %c0_i32 = arith.constant 0 : i32
    %c0_i32_0 = arith.constant 0 : i32
    %c0_i32_1 = arith.constant 0 : i32
    return %c0_i32, %c0_i32_0 : i32, i32
  }
  func.func @transform_4(%arg0: i32) -> (i32, i32) {
    %c0_i32 = arith.constant 0 : i32
    %c0_i32_0 = arith.constant 0 : i32
    %c0_i32_1 = arith.constant 0 : i32
    return %c0_i32, %c0_i32_0 : i32, i32
  }
  func.func @transform_5(%arg0: i32) -> (i32, i32) {
    %c0_i32 = arith.constant 0 : i32
    %c0_i32_0 = arith.constant 0 : i32
    %c0_i32_1 = arith.constant 0 : i32
    return %c0_i32, %c0_i32_0 : i32, i32
  }
  func.func @transform_6(%arg0: i32) -> (i32, i32) {
    %c0_i32 = arith.constant 0 : i32
    %c0_i32_0 = arith.constant 0 : i32
    %c0_i32_1 = arith.constant 0 : i32
    return %c0_i32, %c0_i32_0 : i32, i32
  }
  func.func @transform_7(%arg0: i32) -> (i32, i32) {
    %c0_i32 = arith.constant 0 : i32
    %c0_i32_0 = arith.constant 0 : i32
    return %arg0, %c0_i32 : i32, i32
  }
}

module attributes {stable_mosaic.version = 11 : i64} {
  func.func @_linear_kernel_single_k(%arg0: i32, %arg1: i32, %arg2: memref<16x128xf32, #tpu.memory_space<vmem>>, %arg3: memref<128x128xf32, #tpu.memory_space<vmem>>, %arg4: memref<1x128xf32, #tpu.memory_space<vmem>>, %arg5: memref<16x128xf32, #tpu.memory_space<vmem>>) attributes {dimension_semantics = [#tpu.dimension_semantics<parallel>, #tpu.dimension_semantics<parallel>], iteration_bounds = array<i64: 1, 1>, scalar_prefetch = 0 : i64, scratch_operands = 0 : i64, tpu.core_type = #tpu.core_type<tc>, window_params = [{transform_indices = @transform_0, window_bounds = array<i64: 16, 128>}, {transform_indices = @transform_1, window_bounds = array<i64: 128, 128>}, {transform_indices = @transform_2, window_bounds = array<i64: 1, 128>}, {transform_indices = @transform_3, window_bounds = array<i64: 16, 128>}]} {
    %c0 = arith.constant 0 : index
    %c0_0 = arith.constant 0 : index
    %0 = vector.load %arg2[%c0, %c0_0] : memref<16x128xf32, #tpu.memory_space<vmem>>, vector<16x128xf32>
    %c0_1 = arith.constant 0 : index
    %c0_2 = arith.constant 0 : index
    %1 = vector.load %arg3[%c0_1, %c0_2] : memref<128x128xf32, #tpu.memory_space<vmem>>, vector<128x128xf32>
    %cst = arith.constant dense<0.000000e+00> : vector<16x128xf32>
    %2 = tpu.matmul %0, %1, %cst {dimension_numbers = #tpu.dot_dimension_numbers<[1], [0], [0], [1], [0, 0, 1, 1], [], []>} : vector<16x128xf32>, vector<128x128xf32>, vector<16x128xf32> -> vector<16x128xf32>
    %c0_3 = arith.constant 0 : index
    %c0_4 = arith.constant 0 : index
    %3 = vector.load %arg4[%c0_3, %c0_4] : memref<1x128xf32, #tpu.memory_space<vmem>>, vector<1x128xf32>
    %4 = vector.broadcast %3 : vector<1x128xf32> to vector<16x128xf32>
    %5 = arith.addf %2, %4 : vector<16x128xf32>
    %cst_5 = arith.constant 0.000000e+00 : f32
    %6 = vector.broadcast %cst_5 : f32 to vector<16x128xf32>
    %7 = arith.maximumf %5, %6 : vector<16x128xf32>
    %c0_6 = arith.constant 0 : index
    %c0_7 = arith.constant 0 : index
    %8 = vector.load %arg5[%c0_6, %c0_7] : memref<16x128xf32, #tpu.memory_space<vmem>>, vector<16x128xf32>
    tpu.vector_store %arg5[%c0_6, %c0_7], %7 {strides = array<i32>} : memref<16x128xf32, #tpu.memory_space<vmem>>, vector<16x128xf32>,
    return
  }
  func.func @transform_0(%arg0: i32, %arg1: i32) -> (i32, i32) {
    %c0_i32 = arith.constant 0 : i32
    %c0_i32_0 = arith.constant 0 : i32
    return %arg0, %c0_i32 : i32, i32
  }
  func.func @transform_1(%arg0: i32, %arg1: i32) -> (i32, i32) {
    %c0_i32 = arith.constant 0 : i32
    %c0_i32_0 = arith.constant 0 : i32
    return %c0_i32, %arg1 : i32, i32
  }
  func.func @transform_2(%arg0: i32, %arg1: i32) -> (i32, i32) {
    %c0_i32 = arith.constant 0 : i32
    %c0_i32_0 = arith.constant 0 : i32
    return %c0_i32, %arg1 : i32, i32
  }
  func.func @transform_3(%arg0: i32, %arg1: i32) -> (i32, i32) {
    %c0_i32 = arith.constant 0 : i32
    return %arg0, %arg1 : i32, i32
  }
}

</mosaic_0001>

<bundles_post_ra>
// kernel: tpu_custom_call.1
= control target key start
LH: loop header
LB: loop body
LE: loop exit
PB: predicated region body
PF: predicated region fallthrough
CT: control target
= control target key end

     0   :  { %12 = vsyncpa [#allocation3], 0  ;;  %s931_s0 = inlined_call_operand.hbm [shape: f32[16,128], index: 0, kind: input, shape index: {}]   ;;  %s932_s1 = inlined_call_operand.hbm [shape: f32[128,128], index: 1, kind: input, shape index: {}]   ;;  %s933_s2 = inlined_call_operand.vmem [shape: f32[1,128], index: 2, kind: input, shape index: {}]   ;;  %s934_s3 = inlined_call_operand.hbm [shape: f32[128,128], index: 3, kind: input, shape index: {}]   ;;  %s935_s4 = inlined_call_operand.vmem [shape: f32[1,128], index: 4, kind: input, shape index: {}]   ;;  %s936_s5 = inlined_call_operand.hbm [shape: f32[128,128], index: 5, kind: input, shape index: {}]   ;;  %s937_s6 = inlined_call_operand.vmem [shape: f32[1,128], index: 6, kind: input, shape index: {}]   ;;  %s938_s7 = inlined_call_operand.hbm [shape: f32[16,128], index: 7, kind: output, shape index: {}]  }
   0x1   :  { %13 = vsyncpa [#allocation6], 0 }
   0x2   :  { %14 = vsyncpa [#allocation9], 0 }
   0x3   :  { %15 = vsyncpa [#allocation4], 0  ;;  %s786_s24 = smov [#allocation5]   ;;  %s787_s26 = smov [#allocation2]  }
   0x4   :  { %s33_s25 = sshll.u32 %s786_s24, 4  ;;  %s21_s27 = sshll.u32 %s787_s26, 4  ;;  %s34_s25 = int_to_ptr.vmem [resolvable:$true] %s33_s25  ;;  %s833_s27 = int_to_ptr.vmem [resolvable:$true] %s21_s27 }
   0x5   :  { %s668_s30 = scalar_lea.hbm %s932_s1, 2048 }
   0x6   :  { %p669_p0 = scmp.ne.s32.totalorder %s932_s1, %s668_s30  ;;  %p672_p1 = scmp.lt.u32.totalorder %s668_s30, %s932_s1 }
   0x8   :  { %p674_p2 = pnand %p672_p1, %p669_p0 }
   0xa   :  { %677 = shalt.err (!%p674_p2)
}
   0xb   :  { %s678_s12 = scalar_lea.vmem %s34_s25, 2048  ;;  %p683_p4 = scmp.lt.s32.totalorder %s34_s25, %s34_s25 }
   0xc   :  { %p679_p3 = scmp.ne.s32.totalorder %s34_s25, %s678_s12  ;;  %p684_p5 = scmp.lt.s32.totalorder %s678_s12, %s678_s12 }
   0xe   :  { %p685_p6 = por %p684_p5, %p683_p4 }
  0x10   :  { %p686_p7 = pnand %p685_p6, %p679_p3 }
  0x12   :  { %689 = shalt.err (!%p686_p7)
}
  0x13   :  { %s788_s13 = smov 128   ;;  %s789_s14 = smov 8  }
  0x14   :  { %39 = dma.hbm_to_vmem [thread:$0]  %s932_s1, 2048, %s34_s25, [#allocation6], %s788_s13, %s788_s13, %s789_s14  }
  0x15   :  { %s690_s19 = scalar_lea.hbm %s931_s0, 256 }
  0x16   :  { %p691_p8 = scmp.ne.s32.totalorder %s931_s0, %s690_s19  ;;  %p694_p9 = scmp.lt.u32.totalorder %s690_s19, %s931_s0 }
  0x18   :  { %p696_p10 = pnand %p694_p9, %p691_p8 }
  0x1a   :  { %699 = shalt.err (!%p696_p10)
}
  0x1b   :  { %s700_s24 = scalar_lea.vmem %s833_s27, 256  ;;  %p705_p12 = scmp.lt.s32.totalorder %s833_s27, %s833_s27 }
  0x1c   :  { %p701_p11 = scmp.ne.s32.totalorder %s833_s27, %s700_s24  ;;  %p706_p13 = scmp.lt.s32.totalorder %s700_s24, %s700_s24 }
  0x1e   :  { %p707_p0 = por %p706_p13, %p705_p12 }
  0x20   :  { %p708_p1 = pnand %p707_p0, %p701_p11 }
  0x22   :  { %711 = shalt.err (!%p708_p1)
}
  0x23   :  { %27 = dma.hbm_to_vmem [thread:$0]  %s931_s0, 256, %s833_s27, [#allocation3], %s788_s13, %s788_s13, %s789_s14  }
  0x24   :  { %s790_s26 = smov [#allocation7]   ;;  %s791_s29 = smov [#allocation8]  }
  0x25   :  { %s47_s28 = sshll.u32 %s790_s26, 4  ;;  %s61_s30 = sshll.u32 %s791_s29, 4  ;;  %s48_s28 = int_to_ptr.vmem [resolvable:$true] %s47_s28  ;;  %s870_s30 = int_to_ptr.vmem [resolvable:$true] %s61_s30 }
  0x26   :  { %s712_s10 = scalar_lea.hbm %s934_s3, 2048 }
  0x27   :  { %p713_p2 = scmp.ne.s32.totalorder %s934_s3, %s712_s10  ;;  %p716_p3 = scmp.lt.u32.totalorder %s712_s10, %s934_s3 }
  0x29   :  { %p718_p4 = pnand %p716_p3, %p713_p2 }
  0x2b   :  { %721 = shalt.err (!%p718_p4)
}
  0x2c   :  { %s722_s0 = scalar_lea.vmem %s48_s28, 2048  ;;  %p727_p6 = scmp.lt.s32.totalorder %s48_s28, %s48_s28 }
  0x2d   :  { %p723_p5 = scmp.ne.s32.totalorder %s48_s28, %s722_s0  ;;  %p728_p7 = scmp.lt.s32.totalorder %s722_s0, %s722_s0 }
  0x2f   :  { %p729_p8 = por %p728_p7, %p727_p6 }
  0x31   :  { %p730_p9 = pnand %p729_p8, %p723_p5 }
  0x33   :  { %733 = shalt.err (!%p730_p9)
}
  0x34   :  { %53 = dma.hbm_to_vmem [thread:$0]  %s934_s3, 2048, %s48_s28, [#allocation6], %s788_s13, %s788_s13, %s789_s14  }
  0x35   :  { %s734_s20 = scalar_lea.hbm %s936_s5, 2048 }
  0x36   :  { %p735_p10 = scmp.ne.s32.totalorder %s936_s5, %s734_s20  ;;  %p738_p11 = scmp.lt.u32.totalorder %s734_s20, %s936_s5 }
  0x38   :  { %p740_p12 = pnand %p738_p11, %p735_p10 }
  0x3a   :  { %743 = shalt.err (!%p740_p12)
}
  0x3b   :  { %s744_s1 = scalar_lea.vmem %s870_s30, 2048  ;;  %p749_p0 = scmp.lt.s32.totalorder %s870_s30, %s870_s30 }
  0x3c   :  { %p745_p13 = scmp.ne.s32.totalorder %s870_s30, %s744_s1  ;;  %p750_p1 = scmp.lt.s32.totalorder %s744_s1, %s744_s1 }
  0x3e   :  { %p751_p2 = por %p750_p1, %p749_p0 }
  0x40   :  { %p752_p3 = pnand %p751_p2, %p745_p13 }
  0x42   :  { %755 = shalt.err (!%p752_p3)
}
  0x43   :  { %67 = dma.hbm_to_vmem [thread:$0]  %s936_s5, 2048, %s870_s30, [#allocation9], %s788_s13, %s788_s13, %s789_s14  }
  0x44   :  { %778 = dma.done.wait [#allocation3], 256  }
  0x45   :  { %779 = vsyncadd [#allocation3], 4294967040 }
  0x46   :  { %780 = dma.done.wait [#allocation6], 4096  }
  0x47   :  { %781 = vsyncadd [#allocation6], 4294963200 }
  0x48   :  { %782 = dma.done.wait [#allocation9], 2048  }
  0x49   :  { %783 = vsyncadd [#allocation9], 4294965248  ;;  %v84_v0 = vld [vmem:[#allocation5] sm:$0xff]  ;;  %v85_v1 = vld [vmem:[#allocation5 + $0x8] sm:$0xff]  ;;  %s792_s8 = smov [#allocation10]  }
  0x4a   :  { %v86_v2 = vld [vmem:[#allocation5 + $0x10] sm:$0xff]  ;;  %v565_v3 = vpack.c.bf16 %v85_v1, %v84_v0  ;;  %v87_v4 = vld [vmem:[#allocation5 + $0x18] sm:$0xff]  ;;  %v88_v6 = vld [vmem:[#allocation5 + $0x20] sm:$0xff]  ;;  %s389_s9 = sshll.u32 %s792_s8, 4  ;;  %s390_s9 = int_to_ptr.vmem [resolvable:$true] %s389_s9 }
  0x4b   :  { %v569_v5 = vpack.c.bf16 %v87_v4, %v86_v2  ;;  %v89_v7 = vld [vmem:[#allocation5 + $0x28] sm:$0xff]  ;;  %v90_v9 = vld [vmem:[#allocation5 + $0x30] sm:$0xff]  ;;  %v91_v10 = vld [vmem:[#allocation5 + $0x38] sm:$0xff]  ;;  %p761_p5 = scmp.lt.s32.totalorder %s390_s9, %s390_s9 }
  0x4c   :  { %566 = vmatprep.subr.bf16.mxu0 %v565_v3  ;;  %v573_v8 = vpack.c.bf16 %v89_v7, %v88_v6  ;;  %v82_v11 = vld [vmem:[#allocation2] sm:$0xff]  ;;  %v184_v12 = vld [vmem:[#allocation7] sm:$0xff]  ;;  %v185_v13 = vld [vmem:[#allocation7 + $0x8] sm:$0xff]  ;;  %v577_v20 = vpack.c.bf16 %v91_v10, %v90_v9 }
  0x4d   :  { %568 = vmatpush3.bf16.msra.mxu0 %v565_v3  ;;  %492 = vmatprep.mubr.f32.mxu0 %v82_v11  ;;  %v186_v14 = vld [vmem:[#allocation7 + $0x10] sm:$0xff]  ;;  %v597_v15 = vpack.c.bf16 %v185_v13, %v184_v12  ;;  %v187_v16 = vld [vmem:[#allocation7 + $0x18] sm:$0xff]  ;;  %v188_v18 = vld [vmem:[#allocation7 + $0x20] sm:$0xff] }
  0x4e   :  { %570 = vmatprep.subr.bf16.mxu0 %v569_v5  ;;  %v601_v17 = vpack.c.bf16 %v187_v16, %v186_v14  ;;  %v189_v19 = vld [vmem:[#allocation7 + $0x28] sm:$0xff]  ;;  %v92_v21 = vld [vmem:[#allocation5 + $0x40] sm:$0xff]  ;;  %v190_v24 = vld [vmem:[#allocation7 + $0x30] sm:$0xff] }
  0x4f   :  { %598 = vmatprep.subr.bf16.mxu1 %v597_v15  ;;  %v93_v22 = vld [vmem:[#allocation5 + $0x48] sm:$0xff]  ;;  %v605_v23 = vpack.c.bf16 %v189_v19, %v188_v18  ;;  %v191_v25 = vld [vmem:[#allocation7 + $0x38] sm:$0xff]  ;;  %v94_v27 = vld [vmem:[#allocation5 + $0x50] sm:$0xff] }
  0x50   :  { %600 = vmatpush3.bf16.msra.mxu1 %v597_v15  ;;  %v581_v26 = vpack.c.bf16 %v93_v22, %v92_v21  ;;  %v95_v28 = vld [vmem:[#allocation5 + $0x58] sm:$0xff]  ;;  %v609_v29 = vpack.c.bf16 %v191_v25, %v190_v24  ;;  %v192_v30 = vld [vmem:[#allocation7 + $0x40] sm:$0xff]  ;;  %v193_v31 = vld [vmem:[#allocation7 + $0x48] sm:$0xff] }
  0x51   :  { %572 = vmatpush3.bf16.msra.mxu0 %v569_v5  ;;  %602 = vmatprep.subr.bf16.mxu1 %v601_v17  ;;  %v585_v32 = vpack.c.bf16 %v95_v28, %v94_v27  ;;  %v96_v33 = vld [vmem:[#allocation5 + $0x60] sm:$0xff]  ;;  %v97_v34 = vld [vmem:[#allocation5 + $0x68] sm:$0xff]  ;;  %v613_v35 = vpack.c.bf16 %v193_v31, %v192_v30  ;;  %v194_v36 = vld [vmem:[#allocation7 + $0x50] sm:$0xff] }
  0x52   :  { %574 = vmatprep.subr.bf16.mxu0 %v573_v8  ;;  %v195_v37 = vld [vmem:[#allocation7 + $0x58] sm:$0xff]  ;;  %v589_v38 = vpack.c.bf16 %v97_v34, %v96_v33  ;;  %v98_v39 = vld [vmem:[#allocation5 + $0x70] sm:$0xff]  ;;  %v196_v42 = vld [vmem:[#allocation7 + $0x60] sm:$0xff] }
  0x53   :  { %v99_v40 = vld [vmem:[#allocation5 + $0x78] sm:$0xff]  ;;  %v617_v41 = vpack.c.bf16 %v195_v37, %v194_v36  ;;  %v197_v43 = vld [vmem:[#allocation7 + $0x68] sm:$0xff]  ;;  %v198_v47 = vld [vmem:[#allocation7 + $0x70] sm:$0xff] }
  0x54   :  { %604 = vmatpush3.bf16.msra.mxu1 %v601_v17  ;;  %v593_v44 = vpack.c.bf16 %v99_v40, %v98_v39  ;;  %v621_v45 = vpack.c.bf16 %v197_v43, %v196_v42  ;;  %v83_v46 = vld [vmem:[#allocation2 + $0x8] sm:$0xff]  ;;  %v284_v50 = vld [vmem:[#allocation8] sm:$0xff]  ;;  %v285_v51 = vld [vmem:[#allocation8 + $0x8] sm:$0xff] }
  0x55   :  { %576 = vmatpush3.bf16.msra.mxu0 %v573_v8  ;;  %606 = vmatprep.subr.bf16.mxu1 %v605_v23  ;;  %v199_v48 = vld [vmem:[#allocation7 + $0x78] sm:$0xff]  ;;  %v286_v52 = vld [vmem:[#allocation8 + $0x10] sm:$0xff]  ;;  %v629_v53 = vpack.c.bf16 %v285_v51, %v284_v50  ;;  %v288_v56 = vld [vmem:[#allocation8 + $0x20] sm:$0xff] }
  0x56   :  { %578 = vmatprep.subr.bf16.mxu0 %v577_v20  ;;  %v625_v49 = vpack.c.bf16 %v199_v48, %v198_v47  ;;  %v287_v54 = vld [vmem:[#allocation8 + $0x18] sm:$0xff]  ;;  %v289_v57 = vld [vmem:[#allocation8 + $0x28] sm:$0xff]  ;;  %v290_v59 = vld [vmem:[#allocation8 + $0x30] sm:$0xff] }
  0x57   :  { %v633_v55 = vpack.c.bf16 %v287_v54, %v286_v52  ;;  %v637_v58 = vpack.c.bf16 %v289_v57, %v288_v56  ;;  %v291_v60 = vld [vmem:[#allocation8 + $0x38] sm:$0xff]  ;;  %v292_v62 = vld [vmem:[#allocation8 + $0x40] sm:$0xff]  ;;  %v293_v63 = vld [vmem:[#allocation8 + $0x48] sm:$0xff] }
  0x58   :  { %608 = vmatpush3.bf16.msra.mxu1 %v605_v23  ;;  %v641_v61 = vpack.c.bf16 %v291_v60, %v290_v59  ;;  %v645_v0 = vpack.c.bf16 %v293_v63, %v292_v62  ;;  %v294_v1 = vld [vmem:[#allocation8 + $0x50] sm:$0xff]  ;;  %v295_v2 = vld [vmem:[#allocation8 + $0x58] sm:$0xff]  ;;  %v296_v4 = vld [vmem:[#allocation8 + $0x60] sm:$0xff] }
  0x59   :  { %580 = vmatpush3.bf16.msra.mxu0 %v577_v20  ;;  %610 = vmatprep.subr.bf16.mxu1 %v609_v29  ;;  %v649_v3 = vpack.c.bf16 %v295_v2, %v294_v1  ;;  %v297_v5 = vld [vmem:[#allocation8 + $0x68] sm:$0xff]  ;;  %v403_v7 = vld [vmem:[%s933_s2] ss:$0 sm:$0xff]  ;;  %v299_v15 = vld [vmem:[#allocation8 + $0x78] sm:$0xff] }
  0x5a   :  { %582 = vmatprep.subr.bf16.mxu0 %v581_v26  ;;  %v653_v6 = vpack.c.bf16 %v297_v5, %v296_v4  ;;  %v298_v14 = vld [vmem:[#allocation8 + $0x70] sm:$0xff] }
  0x5b   :  { %v657_v16 = vpack.c.bf16 %v299_v15, %v298_v14  ;;  %v404_v17 = vld [vmem:[%s935_s4] ss:$0 sm:$0xff]  ;;  %s756_s4 = scalar_lea.vmem %s390_s9, 256 }
  0x5c   :  { %612 = vmatpush3.bf16.msra.mxu1 %v609_v29  ;;  %v405_v24 = vld [vmem:[%s937_s6] ss:$0 sm:$0xff]  ;;  %p757_p4 = scmp.ne.s32.totalorder %s390_s9, %s756_s4  ;;  %p762_p6 = scmp.lt.s32.totalorder %s756_s4, %s756_s4 }
  0x5d   :  { %584 = vmatpush3.bf16.msra.mxu0 %v581_v26  ;;  %614 = vmatprep.subr.bf16.mxu1 %v613_v35 }
  0x5e   :  { %586 = vmatprep.subr.bf16.mxu0 %v585_v32  ;;  %p763_p7 = por %p762_p6, %p761_p5 }
  0x60   :  { %616 = vmatpush3.bf16.msra.mxu1 %v613_v35  ;;  %p764_p8 = pnand %p763_p7, %p757_p4 }
  0x61   :  { %588 = vmatpush3.bf16.msra.mxu0 %v585_v32  ;;  %618 = vmatprep.subr.bf16.mxu1 %v617_v41 }
  0x62   :  { %590 = vmatprep.subr.bf16.mxu0 %v589_v38 }
  0x64   :  { %620 = vmatpush3.bf16.msra.mxu1 %v617_v41 }
  0x65   :  { %592 = vmatpush3.bf16.msra.mxu0 %v589_v38  ;;  %622 = vmatprep.subr.bf16.mxu1 %v621_v45 }
  0x66   :  { %594 = vmatprep.subr.bf16.mxu0 %v593_v44 }
  0x68   :  { %624 = vmatpush3.bf16.msra.mxu1 %v621_v45 }
  0x69   :  { %596 = vmatpush3.bf16.msra.mxu0 %v593_v44  ;;  %626 = vmatprep.subr.bf16.mxu1 %v625_v49 }
  0x6a   :  { %630 = vmatprep.subr.bf16.mxu0 %v629_v53 }
  0x6c   :  { %493 = vmatmul.mubr.f32.vlgmr.msra.gmra.mrb[0].mxu0 %v83_v46  ;;  %628 = vmatpush3.bf16.msra.mxu1 %v625_v49 }
  0x6d   :  { %632 = vmatpush3.bf16.msra.mxu0 %v629_v53 }
  0x6e   :  { %634 = vmatprep.subr.bf16.mxu0 %v633_v55 }
  0x71   :  { %636 = vmatpush3.bf16.msra.mxu0 %v633_v55 }
  0x72   :  { %638 = vmatprep.subr.bf16.mxu0 %v637_v58 }
  0x75   :  { %640 = vmatpush3.bf16.msra.mxu0 %v637_v58 }
  0x76   :  { %642 = vmatprep.subr.bf16.mxu0 %v641_v61 }
  0x79   :  { %644 = vmatpush3.bf16.msra.mxu0 %v641_v61 }
  0x7a   :  { %646 = vmatprep.subr.bf16.mxu0 %v645_v0 }
  0x7d   :  { %648 = vmatpush3.bf16.msra.mxu0 %v645_v0 }
  0x7e   :  { %650 = vmatprep.subr.bf16.mxu0 %v649_v3 }
  0x81   :  { %652 = vmatpush3.bf16.msra.mxu0 %v649_v3 }
  0x82   :  { %654 = vmatprep.subr.bf16.mxu0 %v653_v6 }
  0x85   :  { %656 = vmatpush3.bf16.msra.mxu0 %v653_v6 }
  0x86   :  { %658 = vmatprep.subr.bf16.mxu0 %v657_v16 }
  0x89   :  { %660 = vmatpush3.bf16.msra.mxu0 %v657_v16 }
 0x13f   :  { %v494_v8 = vpop.f32.mrb[0].mxu0 }
 0x140   :  { %v179_v9 = vadd.f32 %v494_v8, %v403_v7  ;;  %v173_v10 = vpop.f32.mrb[1].mxu0 }
 0x141   :  { %v174_v11 = vadd.f32 %v403_v7, %v173_v10 }
 0x142   :  { %v183_v13 = vmax.f32 %v179_v9, 0.0 }
 0x143   :  { %v182_v12 = vmax.f32 %v174_v11, 0.0 }
 0x145   :  { %527 = vmatprep.mubr.f32.mxu1 %v182_v12 }
 0x146   :  { %528 = vmatmul.mubr.f32.vlgmr.msra.gmra.mrb[0].mxu1 %v183_v13 }
 0x219   :  { %v529_v18 = vpop.f32.mrb[0].mxu1 }
 0x21a   :  { %v279_v19 = vadd.f32 %v529_v18, %v404_v17  ;;  %v273_v20 = vpop.f32.mrb[1].mxu1 }
 0x21b   :  { %v274_v21 = vadd.f32 %v404_v17, %v273_v20 }
 0x21c   :  { %v283_v23 = vmax.f32 %v279_v19, 0.0 }
 0x21d   :  { %v282_v22 = vmax.f32 %v274_v21, 0.0 }
 0x21f   :  { %562 = vmatprep.mubr.f32.mxu0 %v282_v22 }
 0x220   :  { %563 = vmatmul.mubr.f32.vlgmr.msra.gmra.mrb[2].mxu0 %v283_v23 }
 0x2f3   :  { %v564_v25 = vpop.f32.mrb[2].mxu0 }
 0x2f4   :  { %v379_v26 = vadd.f32 %v564_v25, %v405_v24  ;;  %v373_v27 = vpop.f32.mrb[3].mxu0 }
 0x2f5   :  { %v374_v28 = vadd.f32 %v405_v24, %v373_v27 }
 0x2f6   :  { %383 = vst [vmem:[#allocation10 + $0x8] sm:$0xff] %v379_v26 }
 0x2f7   :  { %382 = vst [vmem:[#allocation10] sm:$0xff] %v374_v28 }
 0x2f8   :  { %767 = shalt.err (!%p764_p8)
}
 0x2f9   :  { %s768_s6 = scalar_lea.hbm %s938_s7, 256 }
 0x2fa   :  { %p769_p9 = scmp.ne.s32.totalorder %s938_s7, %s768_s6  ;;  %p772_p10 = scmp.lt.u32.totalorder %s768_s6, %s938_s7 }
 0x2fc   :  { %p774_p11 = pnand %p772_p10, %p769_p9 }
 0x2fe   :  { %777 = shalt.err (!%p774_p11)
}
 0x2ff   :  { %395 = dma.vmem_to_hbm [thread:$0]  %s390_s9, 256, %s938_s7, [#allocation4], %s788_s13, %s788_s13, %s789_s14  }
 0x300   :  { %784 = dma.done.wait [#allocation4], 256  }
 0x301   :  { %785 = vsyncadd [#allocation4], 4294967040 }
 0x302   :  { %399 = vsyncpa [#allocation3], 1 }
 0x303   :  { %400 = vsyncpa [#allocation6], 1 }
 0x304   :  { %401 = vsyncpa [#allocation9], 1 }
 0x305   :  { %402 = vsyncpa [#allocation4], 1 }

// kernel: tpu_custom_call.1
= control target key start
LH: loop header
LB: loop body
LE: loop exit
PB: predicated region body
PF: predicated region fallthrough
CT: control target
= control target key end

     0   :  { %12 = vsyncpa [#allocation3], 0  ;;  %s931_s0 = inlined_call_operand.hbm [shape: f32[16,128], index: 0, kind: input, shape index: {}]   ;;  %s932_s1 = inlined_call_operand.hbm [shape: f32[128,128], index: 1, kind: input, shape index: {}]   ;;  %s933_s2 = inlined_call_operand.vmem [shape: f32[1,128], index: 2, kind: input, shape index: {}]   ;;  %s934_s3 = inlined_call_operand.hbm [shape: f32[128,128], index: 3, kind: input, shape index: {}]   ;;  %s935_s4 = inlined_call_operand.vmem [shape: f32[1,128], index: 4, kind: input, shape index: {}]   ;;  %s936_s5 = inlined_call_operand.hbm [shape: f32[128,128], index: 5, kind: input, shape index: {}]   ;;  %s937_s6 = inlined_call_operand.vmem [shape: f32[1,128], index: 6, kind: input, shape index: {}]   ;;  %s938_s7 = inlined_call_operand.hbm [shape: f32[16,128], index: 7, kind: output, shape index: {}]  }
   0x1   :  { %13 = vsyncpa [#allocation6], 0 }
   0x2   :  { %14 = vsyncpa [#allocation9], 0 }
   0x3   :  { %15 = vsyncpa [#allocation4], 0  ;;  %s786_s24 = smov [#allocation5]   ;;  %s787_s26 = smov [#allocation2]  }
   0x4   :  { %s33_s25 = sshll.u32 %s786_s24, 4  ;;  %s21_s27 = sshll.u32 %s787_s26, 4  ;;  %s34_s25 = int_to_ptr.vmem [resolvable:$true] %s33_s25  ;;  %s833_s27 = int_to_ptr.vmem [resolvable:$true] %s21_s27 }
   0x5   :  { %s668_s30 = scalar_lea.hbm %s932_s1, 2048 }
   0x6   :  { %p669_p0 = scmp.ne.s32.totalorder %s932_s1, %s668_s30  ;;  %p672_p1 = scmp.lt.u32.totalorder %s668_s30, %s932_s1 }
   0x8   :  { %p674_p2 = pnand %p672_p1, %p669_p0 }
   0xa   :  { %677 = shalt.err (!%p674_p2)
}
   0xb   :  { %s678_s12 = scalar_lea.vmem %s34_s25, 2048  ;;  %p683_p4 = scmp.lt.s32.totalorder %s34_s25, %s34_s25 }
   0xc   :  { %p679_p3 = scmp.ne.s32.totalorder %s34_s25, %s678_s12  ;;  %p684_p5 = scmp.lt.s32.totalorder %s678_s12, %s678_s12 }
   0xe   :  { %p685_p6 = por %p684_p5, %p683_p4 }
  0x10   :  { %p686_p7 = pnand %p685_p6, %p679_p3 }
  0x12   :  { %689 = shalt.err (!%p686_p7)
}
  0x13   :  { %s788_s13 = smov 128   ;;  %s789_s14 = smov 8  }
  0x14   :  { %39 = dma.hbm_to_vmem [thread:$0]  %s932_s1, 2048, %s34_s25, [#allocation6], %s788_s13, %s788_s13, %s789_s14  }
  0x15   :  { %s690_s19 = scalar_lea.hbm %s931_s0, 256 }
  0x16   :  { %p691_p8 = scmp.ne.s32.totalorder %s931_s0, %s690_s19  ;;  %p694_p9 = scmp.lt.u32.totalorder %s690_s19, %s931_s0 }
  0x18   :  { %p696_p10 = pnand %p694_p9, %p691_p8 }
  0x1a   :  { %699 = shalt.err (!%p696_p10)
}
  0x1b   :  { %s700_s24 = scalar_lea.vmem %s833_s27, 256  ;;  %p705_p12 = scmp.lt.s32.totalorder %s833_s27, %s833_s27 }
  0x1c   :  { %p701_p11 = scmp.ne.s32.totalorder %s833_s27, %s700_s24  ;;  %p706_p13 = scmp.lt.s32.totalorder %s700_s24, %s700_s24 }
  0x1e   :  { %p707_p0 = por %p706_p13, %p705_p12 }
  0x20   :  { %p708_p1 = pnand %p707_p0, %p701_p11 }
  0x22   :  { %711 = shalt.err (!%p708_p1)
}
  0x23   :  { %27 = dma.hbm_to_vmem [thread:$0]  %s931_s0, 256, %s833_s27, [#allocation3], %s788_s13, %s788_s13, %s789_s14  }
  0x24   :  { %s790_s26 = smov [#allocation7]   ;;  %s791_s29 = smov [#allocation8]  }
  0x25   :  { %s47_s28 = sshll.u32 %s790_s26, 4  ;;  %s61_s30 = sshll.u32 %s791_s29, 4  ;;  %s48_s28 = int_to_ptr.vmem [resolvable:$true] %s47_s28  ;;  %s870_s30 = int_to_ptr.vmem [resolvable:$true] %s61_s30 }
  0x26   :  { %s712_s10 = scalar_lea.hbm %s934_s3, 2048 }
  0x27   :  { %p713_p2 = scmp.ne.s32.totalorder %s934_s3, %s712_s10  ;;  %p716_p3 = scmp.lt.u32.totalorder %s712_s10, %s934_s3 }
  0x29   :  { %p718_p4 = pnand %p716_p3, %p713_p2 }
  0x2b   :  { %721 = shalt.err (!%p718_p4)
}
  0x2c   :  { %s722_s0 = scalar_lea.vmem %s48_s28, 2048  ;;  %p727_p6 = scmp.lt.s32.totalorder %s48_s28, %s48_s28 }
  0x2d   :  { %p723_p5 = scmp.ne.s32.totalorder %s48_s28, %s722_s0  ;;  %p728_p7 = scmp.lt.s32.totalorder %s722_s0, %s722_s0 }
  0x2f   :  { %p729_p8 = por %p728_p7, %p727_p6 }
  0x31   :  { %p730_p9 = pnand %p729_p8, %p723_p5 }
  0x33   :  { %733 = shalt.err (!%p730_p9)
}
  0x34   :  { %53 = dma.hbm_to_vmem [thread:$0]  %s934_s3, 2048, %s48_s28, [#allocation6], %s788_s13, %s788_s13, %s789_s14  }
  0x35   :  { %s734_s20 = scalar_lea.hbm %s936_s5, 2048 }
  0x36   :  { %p735_p10 = scmp.ne.s32.totalorder %s936_s5, %s734_s20  ;;  %p738_p11 = scmp.lt.u32.totalorder %s734_s20, %s936_s5 }
  0x38   :  { %p740_p12 = pnand %p738_p11, %p735_p10 }
  0x3a   :  { %743 = shalt.err (!%p740_p12)
}
  0x3b   :  { %s744_s1 = scalar_lea.vmem %s870_s30, 2048  ;;  %p749_p0 = scmp.lt.s32.totalorder %s870_s30, %s870_s30 }
  0x3c   :  { %p745_p13 = scmp.ne.s32.totalorder %s870_s30, %s744_s1  ;;  %p750_p1 = scmp.lt.s32.totalorder %s744_s1, %s744_s1 }
  0x3e   :  { %p751_p2 = por %p750_p1, %p749_p0 }
  0x40   :  { %p752_p3 = pnand %p751_p2, %p745_p13 }
  0x42   :  { %755 = shalt.err (!%p752_p3)
}
  0x43   :  { %67 = dma.hbm_to_vmem [thread:$0]  %s936_s5, 2048, %s870_s30, [#allocation9], %s788_s13, %s788_s13, %s789_s14  }
  0x44   :  { %778 = dma.done.wait [#allocation3], 256  }
  0x45   :  { %779 = vsyncadd [#allocation3], 4294967040 }
  0x46   :  { %780 = dma.done.wait [#allocation6], 4096  }
  0x47   :  { %781 = vsyncadd [#allocation6], 4294963200 }
  0x48   :  { %782 = dma.done.wait [#allocation9], 2048  }
  0x49   :  { %783 = vsyncadd [#allocation9], 4294965248  ;;  %v84_v0 = vld [vmem:[#allocation5] sm:$0xff]  ;;  %v85_v1 = vld [vmem:[#allocation5 + $0x8] sm:$0xff]  ;;  %s792_s8 = smov [#allocation10]  }
  0x4a   :  { %v86_v2 = vld [vmem:[#allocation5 + $0x10] sm:$0xff]  ;;  %v565_v3 = vpack.c.bf16 %v85_v1, %v84_v0  ;;  %v87_v4 = vld [vmem:[#allocation5 + $0x18] sm:$0xff]  ;;  %v88_v6 = vld [vmem:[#allocation5 + $0x20] sm:$0xff]  ;;  %s389_s9 = sshll.u32 %s792_s8, 4  ;;  %s390_s9 = int_to_ptr.vmem [resolvable:$true] %s389_s9 }
  0x4b   :  { %v569_v5 = vpack.c.bf16 %v87_v4, %v86_v2  ;;  %v89_v7 = vld [vmem:[#allocation5 + $0x28] sm:$0xff]  ;;  %v90_v9 = vld [vmem:[#allocation5 + $0x30] sm:$0xff]  ;;  %v91_v10 = vld [vmem:[#allocation5 + $0x38] sm:$0xff]  ;;  %p761_p5 = scmp.lt.s32.totalorder %s390_s9, %s390_s9 }
  0x4c   :  { %566 = vmatprep.subr.bf16.mxu0 %v565_v3  ;;  %v573_v8 = vpack.c.bf16 %v89_v7, %v88_v6  ;;  %v82_v11 = vld [vmem:[#allocation2] sm:$0xff]  ;;  %v184_v12 = vld [vmem:[#allocation7] sm:$0xff]  ;;  %v185_v13 = vld [vmem:[#allocation7 + $0x8] sm:$0xff]  ;;  %v577_v20 = vpack.c.bf16 %v91_v10, %v90_v9 }
  0x4d   :  { %568 = vmatpush3.bf16.msra.mxu0 %v565_v3  ;;  %492 = vmatprep.mubr.f32.mxu0 %v82_v11  ;;  %v186_v14 = vld [vmem:[#allocation7 + $0x10] sm:$0xff]  ;;  %v597_v15 = vpack.c.bf16 %v185_v13, %v184_v12  ;;  %v187_v16 = vld [vmem:[#allocation7 + $0x18] sm:$0xff]  ;;  %v188_v18 = vld [vmem:[#allocation7 + $0x20] sm:$0xff] }
  0x4e   :  { %570 = vmatprep.subr.bf16.mxu0 %v569_v5  ;;  %v601_v17 = vpack.c.bf16 %v187_v16, %v186_v14  ;;  %v189_v19 = vld [vmem:[#allocation7 + $0x28] sm:$0xff]  ;;  %v92_v21 = vld [vmem:[#allocation5 + $0x40] sm:$0xff]  ;;  %v190_v24 = vld [vmem:[#allocation7 + $0x30] sm:$0xff] }
  0x4f   :  { %598 = vmatprep.subr.bf16.mxu1 %v597_v15  ;;  %v93_v22 = vld [vmem:[#allocation5 + $0x48] sm:$0xff]  ;;  %v605_v23 = vpack.c.bf16 %v189_v19, %v188_v18  ;;  %v191_v25 = vld [vmem:[#allocation7 + $0x38] sm:$0xff]  ;;  %v94_v27 = vld [vmem:[#allocation5 + $0x50] sm:$0xff] }
  0x50   :  { %600 = vmatpush3.bf16.msra.mxu1 %v597_v15  ;;  %v581_v26 = vpack.c.bf16 %v93_v22, %v92_v21  ;;  %v95_v28 = vld [vmem:[#allocation5 + $0x58] sm:$0xff]  ;;  %v609_v29 = vpack.c.bf16 %v191_v25, %v190_v24  ;;  %v192_v30 = vld [vmem:[#allocation7 + $0x40] sm:$0xff]  ;;  %v193_v31 = vld [vmem:[#allocation7 + $0x48] sm:$0xff] }
  0x51   :  { %572 = vmatpush3.bf16.msra.mxu0 %v569_v5  ;;  %602 = vmatprep.subr.bf16.mxu1 %v601_v17  ;;  %v585_v32 = vpack.c.bf16 %v95_v28, %v94_v27  ;;  %v96_v33 = vld [vmem:[#allocation5 + $0x60] sm:$0xff]  ;;  %v97_v34 = vld [vmem:[#allocation5 + $0x68] sm:$0xff]  ;;  %v613_v35 = vpack.c.bf16 %v193_v31, %v192_v30  ;;  %v194_v36 = vld [vmem:[#allocation7 + $0x50] sm:$0xff] }
  0x52   :  { %574 = vmatprep.subr.bf16.mxu0 %v573_v8  ;;  %v195_v37 = vld [vmem:[#allocation7 + $0x58] sm:$0xff]  ;;  %v589_v38 = vpack.c.bf16 %v97_v34, %v96_v33  ;;  %v98_v39 = vld [vmem:[#allocation5 + $0x70] sm:$0xff]  ;;  %v196_v42 = vld [vmem:[#allocation7 + $0x60] sm:$0xff] }
  0x53   :  { %v99_v40 = vld [vmem:[#allocation5 + $0x78] sm:$0xff]  ;;  %v617_v41 = vpack.c.bf16 %v195_v37, %v194_v36  ;;  %v197_v43 = vld [vmem:[#allocation7 + $0x68] sm:$0xff]  ;;  %v198_v47 = vld [vmem:[#allocation7 + $0x70] sm:$0xff] }
  0x54   :  { %604 = vmatpush3.bf16.msra.mxu1 %v601_v17  ;;  %v593_v44 = vpack.c.bf16 %v99_v40, %v98_v39  ;;  %v621_v45 = vpack.c.bf16 %v197_v43, %v196_v42  ;;  %v83_v46 = vld [vmem:[#allocation2 + $0x8] sm:$0xff]  ;;  %v284_v50 = vld [vmem:[#allocation8] sm:$0xff]  ;;  %v285_v51 = vld [vmem:[#allocation8 + $0x8] sm:$0xff] }
  0x55   :  { %576 = vmatpush3.bf16.msra.mxu0 %v573_v8  ;;  %606 = vmatprep.subr.bf16.mxu1 %v605_v23  ;;  %v199_v48 = vld [vmem:[#allocation7 + $0x78] sm:$0xff]  ;;  %v286_v52 = vld [vmem:[#allocation8 + $0x10] sm:$0xff]  ;;  %v629_v53 = vpack.c.bf16 %v285_v51, %v284_v50  ;;  %v288_v56 = vld [vmem:[#allocation8 + $0x20] sm:$0xff] }
  0x56   :  { %578 = vmatprep.subr.bf16.mxu0 %v577_v20  ;;  %v625_v49 = vpack.c.bf16 %v199_v48, %v198_v47  ;;  %v287_v54 = vld [vmem:[#allocation8 + $0x18] sm:$0xff]  ;;  %v289_v57 = vld [vmem:[#allocation8 + $0x28] sm:$0xff]  ;;  %v290_v59 = vld [vmem:[#allocation8 + $0x30] sm:$0xff] }
  0x57   :  { %v633_v55 = vpack.c.bf16 %v287_v54, %v286_v52  ;;  %v637_v58 = vpack.c.bf16 %v289_v57, %v288_v56  ;;  %v291_v60 = vld [vmem:[#allocation8 + $0x38] sm:$0xff]  ;;  %v292_v62 = vld [vmem:[#allocation8 + $0x40] sm:$0xff]  ;;  %v293_v63 = vld [vmem:[#allocation8 + $0x48] sm:$0xff] }
  0x58   :  { %608 = vmatpush3.bf16.msra.mxu1 %v605_v23  ;;  %v641_v61 = vpack.c.bf16 %v291_v60, %v290_v59  ;;  %v645_v0 = vpack.c.bf16 %v293_v63, %v292_v62  ;;  %v294_v1 = vld [vmem:[#allocation8 + $0x50] sm:$0xff]  ;;  %v295_v2 = vld [vmem:[#allocation8 + $0x58] sm:$0xff]  ;;  %v296_v4 = vld [vmem:[#allocation8 + $0x60] sm:$0xff] }
  0x59   :  { %580 = vmatpush3.bf16.msra.mxu0 %v577_v20  ;;  %610 = vmatprep.subr.bf16.mxu1 %v609_v29  ;;  %v649_v3 = vpack.c.bf16 %v295_v2, %v294_v1  ;;  %v297_v5 = vld [vmem:[#allocation8 + $0x68] sm:$0xff]  ;;  %v403_v7 = vld [vmem:[%s933_s2] ss:$0 sm:$0xff]  ;;  %v299_v15 = vld [vmem:[#allocation8 + $0x78] sm:$0xff] }
  0x5a   :  { %582 = vmatprep.subr.bf16.mxu0 %v581_v26  ;;  %v653_v6 = vpack.c.bf16 %v297_v5, %v296_v4  ;;  %v298_v14 = vld [vmem:[#allocation8 + $0x70] sm:$0xff] }
  0x5b   :  { %v657_v16 = vpack.c.bf16 %v299_v15, %v298_v14  ;;  %v404_v17 = vld [vmem:[%s935_s4] ss:$0 sm:$0xff]  ;;  %s756_s4 = scalar_lea.vmem %s390_s9, 256 }
  0x5c   :  { %612 = vmatpush3.bf16.msra.mxu1 %v609_v29  ;;  %v405_v24 = vld [vmem:[%s937_s6] ss:$0 sm:$0xff]  ;;  %p757_p4 = scmp.ne.s32.totalorder %s390_s9, %s756_s4  ;;  %p762_p6 = scmp.lt.s32.totalorder %s756_s4, %s756_s4 }
  0x5d   :  { %584 = vmatpush3.bf16.msra.mxu0 %v581_v26  ;;  %614 = vmatprep.subr.bf16.mxu1 %v613_v35 }
  0x5e   :  { %586 = vmatprep.subr.bf16.mxu0 %v585_v32  ;;  %p763_p7 = por %p762_p6, %p761_p5 }
  0x60   :  { %616 = vmatpush3.bf16.msra.mxu1 %v613_v35  ;;  %p764_p8 = pnand %p763_p7, %p757_p4 }
  0x61   :  { %588 = vmatpush3.bf16.msra.mxu0 %v585_v32  ;;  %618 = vmatprep.subr.bf16.mxu1 %v617_v41 }
  0x62   :  { %590 = vmatprep.subr.bf16.mxu0 %v589_v38 }
  0x64   :  { %620 = vmatpush3.bf16.msra.mxu1 %v617_v41 }
  0x65   :  { %592 = vmatpush3.bf16.msra.mxu0 %v589_v38  ;;  %622 = vmatprep.subr.bf16.mxu1 %v621_v45 }
  0x66   :  { %594 = vmatprep.subr.bf16.mxu0 %v593_v44 }
  0x68   :  { %624 = vmatpush3.bf16.msra.mxu1 %v621_v45 }
  0x69   :  { %596 = vmatpush3.bf16.msra.mxu0 %v593_v44  ;;  %626 = vmatprep.subr.bf16.mxu1 %v625_v49 }
  0x6a   :  { %630 = vmatprep.subr.bf16.mxu0 %v629_v53 }
  0x6c   :  { %493 = vmatmul.mubr.f32.vlgmr.msra.gmra.mrb[0].mxu0 %v83_v46  ;;  %628 = vmatpush3.bf16.msra.mxu1 %v625_v49 }
  0x6d   :  { %632 = vmatpush3.bf16.msra.mxu0 %v629_v53 }
  0x6e   :  { %634 = vmatprep.subr.bf16.mxu0 %v633_v55 }
  0x71   :  { %636 = vmatpush3.bf16.msra.mxu0 %v633_v55 }
  0x72   :  { %638 = vmatprep.subr.bf16.mxu0 %v637_v58 }
  0x75   :  { %640 = vmatpush3.bf16.msra.mxu0 %v637_v58 }
  0x76   :  { %642 = vmatprep.subr.bf16.mxu0 %v641_v61 }
  0x79   :  { %644 = vmatpush3.bf16.msra.mxu0 %v641_v61 }
  0x7a   :  { %646 = vmatprep.subr.bf16.mxu0 %v645_v0 }
  0x7d   :  { %648 = vmatpush3.bf16.msra.mxu0 %v645_v0 }
  0x7e   :  { %650 = vmatprep.subr.bf16.mxu0 %v649_v3 }
  0x81   :  { %652 = vmatpush3.bf16.msra.mxu0 %v649_v3 }
  0x82   :  { %654 = vmatprep.subr.bf16.mxu0 %v653_v6 }
  0x85   :  { %656 = vmatpush3.bf16.msra.mxu0 %v653_v6 }
  0x86   :  { %658 = vmatprep.subr.bf16.mxu0 %v657_v16 }
  0x89   :  { %660 = vmatpush3.bf16.msra.mxu0 %v657_v16 }
 0x13f   :  { %v494_v8 = vpop.f32.mrb[0].mxu0 }
 0x140   :  { %v179_v9 = vadd.f32 %v494_v8, %v403_v7  ;;  %v173_v10 = vpop.f32.mrb[1].mxu0 }
 0x141   :  { %v174_v11 = vadd.f32 %v403_v7, %v173_v10 }
 0x142   :  { %v183_v13 = vmax.f32 %v179_v9, 0.0 }
 0x143   :  { %v182_v12 = vmax.f32 %v174_v11, 0.0 }
 0x145   :  { %527 = vmatprep.mubr.f32.mxu1 %v182_v12 }
 0x146   :  { %528 = vmatmul.mubr.f32.vlgmr.msra.gmra.mrb[0].mxu1 %v183_v13 }
 0x219   :  { %v529_v18 = vpop.f32.mrb[0].mxu1 }
 0x21a   :  { %v279_v19 = vadd.f32 %v529_v18, %v404_v17  ;;  %v273_v20 = vpop.f32.mrb[1].mxu1 }
 0x21b   :  { %v274_v21 = vadd.f32 %v404_v17, %v273_v20 }
 0x21c   :  { %v283_v23 = vmax.f32 %v279_v19, 0.0 }
 0x21d   :  { %v282_v22 = vmax.f32 %v274_v21, 0.0 }
 0x21f   :  { %562 = vmatprep.mubr.f32.mxu0 %v282_v22 }
 0x220   :  { %563 = vmatmul.mubr.f32.vlgmr.msra.gmra.mrb[2].mxu0 %v283_v23 }
 0x2f3   :  { %v564_v25 = vpop.f32.mrb[2].mxu0 }
 0x2f4   :  { %v379_v26 = vadd.f32 %v564_v25, %v405_v24  ;;  %v373_v27 = vpop.f32.mrb[3].mxu0 }
 0x2f5   :  { %v374_v28 = vadd.f32 %v405_v24, %v373_v27 }
 0x2f6   :  { %383 = vst [vmem:[#allocation10 + $0x8] sm:$0xff] %v379_v26 }
 0x2f7   :  { %382 = vst [vmem:[#allocation10] sm:$0xff] %v374_v28 }
 0x2f8   :  { %767 = shalt.err (!%p764_p8)
}
 0x2f9   :  { %s768_s6 = scalar_lea.hbm %s938_s7, 256 }
 0x2fa   :  { %p769_p9 = scmp.ne.s32.totalorder %s938_s7, %s768_s6  ;;  %p772_p10 = scmp.lt.u32.totalorder %s768_s6, %s938_s7 }
 0x2fc   :  { %p774_p11 = pnand %p772_p10, %p769_p9 }
 0x2fe   :  { %777 = shalt.err (!%p774_p11)
}
 0x2ff   :  { %395 = dma.vmem_to_hbm [thread:$0]  %s390_s9, 256, %s938_s7, [#allocation4], %s788_s13, %s788_s13, %s789_s14  }
 0x300   :  { %784 = dma.done.wait [#allocation4], 256  }
 0x301   :  { %785 = vsyncadd [#allocation4], 4294967040 }
 0x302   :  { %399 = vsyncpa [#allocation3], 1 }
 0x303   :  { %400 = vsyncpa [#allocation6], 1 }
 0x304   :  { %401 = vsyncpa [#allocation9], 1 }
 0x305   :  { %402 = vsyncpa [#allocation4], 1 }

// kernel: tpu_custom_call.1
= control target key start
LH: loop header
LB: loop body
LE: loop exit
PB: predicated region body
PF: predicated region fallthrough
CT: control target
= control target key end

     0   :  { %8 = vsyncpa [#allocation3], 0  ;;  %s401_s0 = inlined_call_operand.hbm [shape: f32[16,128], index: 0, kind: input, shape index: {}]   ;;  %s402_s1 = inlined_call_operand.hbm [shape: f32[128,128], index: 1, kind: input, shape index: {}]   ;;  %s403_s2 = inlined_call_operand.vmem [shape: f32[1,128], index: 2, kind: input, shape index: {}]   ;;  %s404_s3 = inlined_call_operand.hbm [shape: f32[16,128], index: 3, kind: output, shape index: {}]  }
   0x1   :  { %9 = vsyncpa [#allocation6], 0 }
   0x2   :  { %10 = vsyncpa [#allocation4], 0  ;;  %s328_s12 = smov [#allocation2]   ;;  %s256_s16 = scalar_lea.hbm %s401_s0, 256 }
   0x3   :  { %s16_s13 = sshll.u32 %s328_s12, 4  ;;  %p257_p0 = scmp.ne.s32.totalorder %s401_s0, %s256_s16  ;;  %s17_s13 = int_to_ptr.vmem [resolvable:$true] %s16_s13 }
   0x4   :  { %p260_p1 = scmp.lt.u32.totalorder %s256_s16, %s401_s0 }
   0x6   :  { %p262_p2 = pnand %p260_p1, %p257_p0 }
   0x8   :  { %265 = shalt.err (!%p262_p2)
}
   0x9   :  { %s266_s21 = scalar_lea.vmem %s17_s13, 256  ;;  %p271_p4 = scmp.lt.s32.totalorder %s17_s13, %s17_s13 }
   0xa   :  { %p267_p3 = scmp.ne.s32.totalorder %s17_s13, %s266_s21  ;;  %p272_p5 = scmp.lt.s32.totalorder %s266_s21, %s266_s21 }
   0xc   :  { %p273_p6 = por %p272_p5, %p271_p4 }
   0xe   :  { %p274_p7 = pnand %p273_p6, %p267_p3 }
  0x10   :  { %277 = shalt.err (!%p274_p7)
}
  0x11   :  { %s329_s22 = smov 128   ;;  %s330_s23 = smov 8  }
  0x12   :  { %22 = dma.hbm_to_vmem [thread:$0]  %s401_s0, 256, %s17_s13, [#allocation3], %s329_s22, %s329_s22, %s330_s23  }
  0x13   :  { %s331_s26 = smov [#allocation5]   ;;  %s278_s30 = scalar_lea.hbm %s402_s1, 2048 }
  0x14   :  { %s28_s27 = sshll.u32 %s331_s26, 4  ;;  %p279_p8 = scmp.ne.s32.totalorder %s402_s1, %s278_s30  ;;  %s29_s27 = int_to_ptr.vmem [resolvable:$true] %s28_s27 }
  0x15   :  { %p282_p9 = scmp.lt.u32.totalorder %s278_s30, %s402_s1 }
  0x17   :  { %p284_p10 = pnand %p282_p9, %p279_p8 }
  0x19   :  { %287 = shalt.err (!%p284_p10)
}
  0x1a   :  { %s288_s8 = scalar_lea.vmem %s29_s27, 2048  ;;  %p293_p12 = scmp.lt.s32.totalorder %s29_s27, %s29_s27 }
  0x1b   :  { %p289_p11 = scmp.ne.s32.totalorder %s29_s27, %s288_s8  ;;  %p294_p13 = scmp.lt.s32.totalorder %s288_s8, %s288_s8 }
  0x1d   :  { %p295_p0 = por %p294_p13, %p293_p12 }
  0x1f   :  { %p296_p1 = pnand %p295_p0, %p289_p11 }
  0x21   :  { %299 = shalt.err (!%p296_p1)
}
  0x22   :  { %34 = dma.hbm_to_vmem [thread:$0]  %s402_s1, 2048, %s29_s27, [#allocation6], %s329_s22, %s329_s22, %s330_s23  }
  0x23   :  { %322 = dma.done.wait [#allocation3], 256  }
  0x24   :  { %323 = vsyncadd [#allocation3], 4294967040 }
  0x25   :  { %324 = dma.done.wait [#allocation6], 2048  }
  0x26   :  { %325 = vsyncadd [#allocation6], 4294965248  ;;  %v45_v0 = vld [vmem:[#allocation5] sm:$0xff]  ;;  %v46_v1 = vld [vmem:[#allocation5 + $0x8] sm:$0xff]  ;;  %s332_s11 = smov [#allocation7]  }
  0x27   :  { %v47_v2 = vld [vmem:[#allocation5 + $0x10] sm:$0xff]  ;;  %v219_v3 = vpack.c.bf16 %v46_v1, %v45_v0  ;;  %v48_v4 = vld [vmem:[#allocation5 + $0x18] sm:$0xff]  ;;  %v49_v6 = vld [vmem:[#allocation5 + $0x20] sm:$0xff]  ;;  %s152_s12 = sshll.u32 %s332_s11, 4  ;;  %s153_s12 = int_to_ptr.vmem [resolvable:$true] %s152_s12 }
  0x28   :  { %v223_v5 = vpack.c.bf16 %v48_v4, %v47_v2  ;;  %v50_v7 = vld [vmem:[#allocation5 + $0x28] sm:$0xff]  ;;  %v43_v9 = vld [vmem:[#allocation2] sm:$0xff]  ;;  %v52_v11 = vld [vmem:[#allocation5 + $0x38] sm:$0xff]  ;;  %s300_s13 = scalar_lea.vmem %s153_s12, 256  ;;  %p305_p3 = scmp.lt.s32.totalorder %s153_s12, %s153_s12 }
  0x29   :  { %220 = vmatprep.subr.bf16.mxu0 %v219_v3  ;;  %v227_v8 = vpack.c.bf16 %v50_v7, %v49_v6  ;;  %v51_v10 = vld [vmem:[#allocation5 + $0x30] sm:$0xff]  ;;  %216 = vmatprep.mubr.f32.mxu0 %v43_v9  ;;  %v53_v13 = vld [vmem:[#allocation5 + $0x40] sm:$0xff]  ;;  %v54_v14 = vld [vmem:[#allocation5 + $0x48] sm:$0xff]  ;;  %p301_p2 = scmp.ne.s32.totalorder %s153_s12, %s300_s13  ;;  %p306_p4 = scmp.lt.s32.totalorder %s300_s13, %s300_s13 }
  0x2a   :  { %222 = vmatpush3.bf16.msra.mxu0 %v219_v3  ;;  %v231_v12 = vpack.c.bf16 %v52_v11, %v51_v10  ;;  %v235_v15 = vpack.c.bf16 %v54_v14, %v53_v13  ;;  %v55_v16 = vld [vmem:[#allocation5 + $0x50] sm:$0xff]  ;;  %v56_v17 = vld [vmem:[#allocation5 + $0x58] sm:$0xff]  ;;  %v57_v19 = vld [vmem:[#allocation5 + $0x60] sm:$0xff] }
  0x2b   :  { %224 = vmatprep.subr.bf16.mxu0 %v223_v5  ;;  %v239_v18 = vpack.c.bf16 %v56_v17, %v55_v16  ;;  %v58_v20 = vld [vmem:[#allocation5 + $0x68] sm:$0xff]  ;;  %v59_v22 = vld [vmem:[#allocation5 + $0x70] sm:$0xff]  ;;  %v60_v23 = vld [vmem:[#allocation5 + $0x78] sm:$0xff]  ;;  %p307_p5 = por %p306_p4, %p305_p3 }
  0x2c   :  { %v243_v21 = vpack.c.bf16 %v58_v20, %v57_v19  ;;  %v247_v24 = vpack.c.bf16 %v60_v23, %v59_v22  ;;  %v44_v25 = vld [vmem:[#allocation2 + $0x8] sm:$0xff]  ;;  %v165_v26 = vld [vmem:[%s403_s2] ss:$0 sm:$0xff] }
  0x2d   :  { %p308_p6 = pnand %p307_p5, %p301_p2 }
  0x2e   :  { %226 = vmatpush3.bf16.msra.mxu0 %v223_v5 }
  0x2f   :  { %228 = vmatprep.subr.bf16.mxu0 %v227_v8 }
  0x32   :  { %230 = vmatpush3.bf16.msra.mxu0 %v227_v8 }
  0x33   :  { %232 = vmatprep.subr.bf16.mxu0 %v231_v12 }
  0x36   :  { %234 = vmatpush3.bf16.msra.mxu0 %v231_v12 }
  0x37   :  { %236 = vmatprep.subr.bf16.mxu0 %v235_v15 }
  0x3a   :  { %238 = vmatpush3.bf16.msra.mxu0 %v235_v15 }
  0x3b   :  { %240 = vmatprep.subr.bf16.mxu0 %v239_v18 }
  0x3e   :  { %242 = vmatpush3.bf16.msra.mxu0 %v239_v18 }
  0x3f   :  { %244 = vmatprep.subr.bf16.mxu0 %v243_v21 }
  0x42   :  { %246 = vmatpush3.bf16.msra.mxu0 %v243_v21 }
  0x43   :  { %248 = vmatprep.subr.bf16.mxu0 %v247_v24 }
  0x46   :  { %250 = vmatpush3.bf16.msra.mxu0 %v247_v24 }
  0x49   :  { %217 = vmatmul.mubr.f32.vlgmr.msra.gmra.mrb[0].mxu0 %v44_v25 }
 0x11c   :  { %v218_v27 = vpop.f32.mrb[0].mxu0 }
 0x11d   :  { %v140_v28 = vadd.f32 %v218_v27, %v165_v26  ;;  %v134_v29 = vpop.f32.mrb[1].mxu0 }
 0x11e   :  { %v135_v30 = vadd.f32 %v165_v26, %v134_v29 }
 0x11f   :  { %v144_v31 = vmax.f32 %v140_v28, 0.0 }
 0x120   :  { %v143_v32 = vmax.f32 %v135_v30, 0.0 }
 0x121   :  { %146 = vst [vmem:[#allocation7 + $0x8] sm:$0xff] %v144_v31 }
 0x122   :  { %145 = vst [vmem:[#allocation7] sm:$0xff] %v143_v32 }
 0x123   :  { %311 = shalt.err (!%p308_p6)
}
 0x124   :  { %s312_s15 = scalar_lea.hbm %s404_s3, 256 }
 0x125   :  { %p313_p7 = scmp.ne.s32.totalorder %s404_s3, %s312_s15  ;;  %p316_p8 = scmp.lt.u32.totalorder %s312_s15, %s404_s3 }
 0x127   :  { %p318_p9 = pnand %p316_p8, %p313_p7 }
 0x129   :  { %321 = shalt.err (!%p318_p9)
}
 0x12a   :  { %158 = dma.vmem_to_hbm [thread:$0]  %s153_s12, 256, %s404_s3, [#allocation4], %s329_s22, %s329_s22, %s330_s23  }
 0x12b   :  { %326 = dma.done.wait [#allocation4], 256  }
 0x12c   :  { %327 = vsyncadd [#allocation4], 4294967040 }
 0x12d   :  { %162 = vsyncpa [#allocation3], 1 }
 0x12e   :  { %163 = vsyncpa [#allocation6], 1 }
 0x12f   :  { %164 = vsyncpa [#allocation4], 1 }

</bundles_post_ra>
